<compile_context>
chip_gen: v7x
topology: tpu7x:2x2x1
jax: 0.10.0
libtpu: 0.0.40
codegen_flags: <defaults>
</compile_context>

<pallas_src>
import functools

import jax
import jax.numpy as jnp
from jax.experimental import pallas as pl
from jax.experimental.pallas import tpu as pltpu


def _focal_kernel(o_ref, t_ref, loss_ref, cnt_ref, *, gamma, ignore_index):
    # o_ref / t_ref : (BR, LANES) f32 tiles
    # loss_ref/cnt_ref: (1, 1, LANES) per-block partial sums (lane-dense rows)
    eps = 1e-8
    o = o_ref[...]
    t = t_ref[...]

    valid = t != ignore_index                      # padding uses ignore_index
    oc = jnp.clip(o, eps, 1.0 - eps)
    tc = jnp.clip(t, eps, 1.0 - eps)
    pt = (1.0 - tc) * (1.0 - oc) + tc * oc         # in (0,1): log/power are safe
    focal = -((1.0 - pt) ** gamma) * jnp.log(pt)   # gamma=2 -> integer power (VPU)

    validf = valid.astype(jnp.float32)
    masked = jnp.where(valid, focal, 0.0)

    # Reduce only along sublanes (axis=0); final lane/grid reduction is tiny
    # and done in JAX on the (G, 1, LANES) partials.
    loss_ref[0] = jnp.sum(masked, axis=0, keepdims=True)
    cnt_ref[0] = jnp.sum(validf, axis=0, keepdims=True)


def focal_loss_2d(outputs, targets, gamma=2, ignore_index=255):
    """Forward pass of FocalLoss2d (masked mean of focal terms)."""
    o_flat = jnp.ravel(outputs).astype(jnp.float32)
    t_flat = jnp.ravel(targets).astype(jnp.float32)
    n = o_flat.shape[0]

    # Lane-dense 2D layout: (rows, LANES) with LANES % 128 == 0, BR % 8 == 0.
    lanes = 1024 if n >= 1024 else 128
    rows = pl.cdiv(n, lanes)
    block_rows = min(512, ((rows + 7) // 8) * 8)
    rows_pad = ((rows + block_rows - 1) // block_rows) * block_rows
    pad = rows_pad * lanes - n

    # Pad targets with ignore_index -> padded elements are masked out inside
    # the kernel and never touch the sum or the count.
    o2 = jnp.pad(o_flat, (0, pad), constant_values=0.5).reshape(rows_pad, lanes)
    t2 = jnp.pad(t_flat, (0, pad),
                 constant_values=float(ignore_index)).reshape(rows_pad, lanes)

    grid = rows_pad // block_rows
    kernel = functools.partial(_focal_kernel,
                               gamma=gamma,
                               ignore_index=float(ignore_index))

    cost = pl.CostEstimate(flops=12 * n, transcendentals=n, bytes_accessed=8 * n)

    loss_part, cnt_part = pl.pallas_call(
        kernel,
        out_shape=(
            jax.ShapeDtypeStruct((grid, 1, lanes), jnp.float32),
            jax.ShapeDtypeStruct((grid, 1, lanes), jnp.float32),
        ),
        grid_spec=pltpu.PrefetchScalarGridSpec(
            num_scalar_prefetch=0,
            grid=(grid,),
            in_specs=[
                pl.BlockSpec((block_rows, lanes), lambda r: (r, 0)),
                pl.BlockSpec((block_rows, lanes), lambda r: (r, 0)),
            ],
            out_specs=[
                pl.BlockSpec((1, 1, lanes), lambda r: (r, 0, 0)),
                pl.BlockSpec((1, 1, lanes), lambda r: (r, 0, 0)),
            ],
        ),
        compiler_params=pltpu.CompilerParams(
            dimension_semantics=("parallel",)),
        cost_estimate=cost,
    )(o2, t2)

    loss_sum = jnp.sum(loss_part)
    count = jnp.sum(cnt_part)
    # Matches torch .mean() over the boolean-masked (non-ignored) elements.
    return loss_sum / count


# ---------------- pure-JAX reference (mirrors the PyTorch forward) -----------
def _focal_loss_ref(outputs, targets, gamma=2, ignore_index=255):
    eps = 1e-8
    o = jnp.ravel(outputs).astype(jnp.float32)
    t = jnp.ravel(targets).astype(jnp.float32)
    valid = t != ignore_index
    oc = jnp.clip(o, eps, 1.0 - eps)
    tc = jnp.clip(t, eps, 1.0 - eps)
    pt = (1.0 - tc) * (1.0 - oc) + tc * oc
    focal = -((1.0 - pt) ** gamma) * jnp.log(pt)
    return jnp.sum(jnp.where(valid, focal, 0.0)) / jnp.sum(valid.astype(jnp.float32))


if __name__ == "__main__":
    key = jax.random.PRNGKey(0)
    k1, k2, k3 = jax.random.split(key, 3)
    B, C, H, W = 2, 4, 16, 16

    # outputs are probabilities in (0,1); targets are binary with some pixels
    # marked ignore_index=255.
    outputs = jax.random.uniform(k1, (B, C, H, W), dtype=jnp.float32,
                                 minval=0.01, maxval=0.99)
    tgt = jax.random.bernoulli(k2, 0.5, (B, C, H, W)).astype(jnp.float32)
    ignore_mask = jax.random.bernoulli(k3, 0.1, (B, C, H, W))
    targets = jnp.where(ignore_mask, 255.0, tgt)

    loss = jax.block_until_ready(focal_loss_2d(outputs, targets))
    ref = jax.block_until_ready(_focal_loss_ref(outputs, targets))

    assert jnp.isfinite(loss), "non-finite loss"
    assert abs(float(loss) - float(ref)) < 1e-5 * max(1.0, abs(float(ref))), (
        float(loss), float(ref))
    print("KERNEL_OK")
</pallas_src>

<mosaic_0001>
module attributes {stable_mosaic.version = 11 : i64} {
  func.func @_focal_kernel(%arg0: i32, %arg1: memref<8x1024xf32, #tpu.memory_space<vmem>>, %arg2: memref<8x1024xf32, #tpu.memory_space<vmem>>, %arg3: memref<1x1x1024xf32, #tpu.memory_space<vmem>>, %arg4: memref<1x1x1024xf32, #tpu.memory_space<vmem>>) attributes {dimension_semantics = [#tpu.dimension_semantics<parallel>], iteration_bounds = array<i64: 1>, scalar_prefetch = 0 : i64, scratch_operands = 0 : i64, tpu.core_type = #tpu.core_type<tc>, window_params = [{transform_indices = @transform_0, window_bounds = array<i64: 8, 1024>}, {transform_indices = @transform_1, window_bounds = array<i64: 8, 1024>}, {transform_indices = @transform_2, window_bounds = array<i64: 1, 1, 1024>}, {transform_indices = @transform_3, window_bounds = array<i64: 1, 1, 1024>}]} {
    %c0 = arith.constant 0 : index
    %c0_0 = arith.constant 0 : index
    %0 = vector.load %arg1[%c0, %c0_0] : memref<8x1024xf32, #tpu.memory_space<vmem>>, vector<8x1024xf32>
    %c0_1 = arith.constant 0 : index
    %c0_2 = arith.constant 0 : index
    %1 = vector.load %arg2[%c0_1, %c0_2] : memref<8x1024xf32, #tpu.memory_space<vmem>>, vector<8x1024xf32>
    %cst = arith.constant 2.550000e+02 : f32
    %2 = vector.broadcast %cst : f32 to vector<8x1024xf32>
    %3 = arith.cmpf one, %1, %2 : vector<8x1024xf32>
    %cst_3 = arith.constant 9.99999993E-9 : f32
    %cst_4 = arith.constant 1.000000e+00 : f32
    %4 = vector.broadcast %cst_3 : f32 to vector<8x1024xf32>
    %5 = arith.maximumf %4, %0 : vector<8x1024xf32>
    %6 = vector.broadcast %cst_4 : f32 to vector<8x1024xf32>
    %7 = arith.minimumf %6, %5 : vector<8x1024xf32>
    %cst_5 = arith.constant 9.99999993E-9 : f32
    %cst_6 = arith.constant 1.000000e+00 : f32
    %8 = vector.broadcast %cst_5 : f32 to vector<8x1024xf32>
    %9 = arith.maximumf %8, %1 : vector<8x1024xf32>
    %10 = vector.broadcast %cst_6 : f32 to vector<8x1024xf32>
    %11 = arith.minimumf %10, %9 : vector<8x1024xf32>
    %cst_7 = arith.constant 1.000000e+00 : f32
    %12 = vector.broadcast %cst_7 : f32 to vector<8x1024xf32>
    %13 = arith.subf %12, %11 : vector<8x1024xf32>
    %cst_8 = arith.constant 1.000000e+00 : f32
    %14 = vector.broadcast %cst_8 : f32 to vector<8x1024xf32>
    %15 = arith.subf %14, %7 : vector<8x1024xf32>
    %16 = arith.mulf %13, %15 : vector<8x1024xf32>
    %17 = arith.mulf %11, %7 : vector<8x1024xf32>
    %18 = arith.addf %16, %17 : vector<8x1024xf32>
    %cst_9 = arith.constant 1.000000e+00 : f32
    %19 = vector.broadcast %cst_9 : f32 to vector<8x1024xf32>
    %20 = arith.subf %19, %18 : vector<8x1024xf32>
    %21 = arith.mulf %20, %20 : vector<8x1024xf32>
    %cst_10 = arith.constant 0.000000e+00 : f32
    %22 = vector.broadcast %cst_10 : f32 to vector<8x1024xf32>
    %23 = arith.subf %22, %21 : vector<8x1024xf32>
    %24 = math.log %18 : vector<8x1024xf32>
    %25 = arith.mulf %23, %24 : vector<8x1024xf32>
    %26 = arith.extui %3 : vector<8x1024xi1> to vector<8x1024xi32>
    %27 = arith.sitofp %26 : vector<8x1024xi32> to vector<8x1024xf32>
    %cst_11 = arith.constant 0.000000e+00 : f32
    %28 = vector.broadcast %cst_11 : f32 to vector<8x1024xf32>
    %29 = arith.select %3, %25, %28 : vector<8x1024xi1>, vector<8x1024xf32>
    %cst_12 = arith.constant dense<0.000000e+00> : vector<1024xf32>
    %30 = vector.multi_reduction <add>, %29, %cst_12 [0] : vector<8x1024xf32> to vector<1024xf32>
    %31 = vector.shape_cast %30 : vector<1024xf32> to vector<1x1024xf32>
    %c0_13 = arith.constant 0 : index
    %c0_14 = arith.constant 0 : index
    %c0_15 = arith.constant 0 : index
    %32 = vector.load %arg3[%c0_13, %c0_14, %c0_15] : memref<1x1x1024xf32, #tpu.memory_space<vmem>>, vector<1x1x1024xf32>
    %33 = vector.shape_cast %32 : vector<1x1x1024xf32> to vector<1x1024xf32>
    %34 = vector.shape_cast %31 : vector<1x1024xf32> to vector<1x1x1024xf32>
    tpu.vector_store %arg3[%c0_13, %c0_14, %c0_15], %34 {strides = array<i32>} : memref<1x1x1024xf32, #tpu.memory_space<vmem>>, vector<1x1x1024xf32>,
    %cst_16 = arith.constant dense<0.000000e+00> : vector<1024xf32>
    %35 = vector.multi_reduction <add>, %27, %cst_16 [0] : vector<8x1024xf32> to vector<1024xf32>
    %36 = vector.shape_cast %35 : vector<1024xf32> to vector<1x1024xf32>
    %c0_17 = arith.constant 0 : index
    %c0_18 = arith.constant 0 : index
    %c0_19 = arith.constant 0 : index
    %37 = vector.load %arg4[%c0_17, %c0_18, %c0_19] : memref<1x1x1024xf32, #tpu.memory_space<vmem>>, vector<1x1x1024xf32>
    %38 = vector.shape_cast %37 : vector<1x1x1024xf32> to vector<1x1024xf32>
    %39 = vector.shape_cast %36 : vector<1x1024xf32> to vector<1x1x1024xf32>
    tpu.vector_store %arg4[%c0_17, %c0_18, %c0_19], %39 {strides = array<i32>} : memref<1x1x1024xf32, #tpu.memory_space<vmem>>, vector<1x1x1024xf32>,
    return
  }
  func.func @transform_0(%arg0: i32) -> (i32, i32) {
    %c0_i32 = arith.constant 0 : i32
    %c0_i32_0 = arith.constant 0 : i32
    return %arg0, %c0_i32 : i32, i32
  }
  func.func @transform_1(%arg0: i32) -> (i32, i32) {
    %c0_i32 = arith.constant 0 : i32
    %c0_i32_0 = arith.constant 0 : i32
    return %arg0, %c0_i32 : i32, i32
  }
  func.func @transform_2(%arg0: i32) -> (i32, i32, i32) {
    %c0_i32 = arith.constant 0 : i32
    %c0_i32_0 = arith.constant 0 : i32
    %c0_i32_1 = arith.constant 0 : i32
    return %arg0, %c0_i32, %c0_i32_0 : i32, i32, i32
  }
  func.func @transform_3(%arg0: i32) -> (i32, i32, i32) {
    %c0_i32 = arith.constant 0 : i32
    %c0_i32_0 = arith.constant 0 : i32
    %c0_i32_1 = arith.constant 0 : i32
    return %arg0, %c0_i32, %c0_i32_0 : i32, i32, i32
  }
}

</mosaic_0001>

<bundles_post_ra>
// kernel: tpu_custom_call.1
= control target key start
LH: loop header
LB: loop body
LE: loop exit
PB: predicated region body
PF: predicated region fallthrough
CT: control target
= control target key end

     0   :  { %9 = vsyncpa [#allocation3], 0  ;;  %s798_s0 = inlined_call_operand.hbm [shape: f32[8,1024], index: 0, kind: input, shape index: {}]   ;;  %s799_s1 = inlined_call_operand.hbm [shape: f32[8,1024], index: 1, kind: input, shape index: {}]   ;;  %s800_s2 = inlined_call_operand.hbm [shape: f32[1,1,1024], index: 2, kind: output, shape index: {0}]   ;;  %s801_s3 = inlined_call_operand.hbm [shape: f32[1,1,1024], index: 3, kind: output, shape index: {1}]  }
   0x1   :  { %10 = vsyncpa [#allocation6], 0 }
   0x2   :  { %11 = vsyncpa [#allocation4], 0 }
   0x3   :  { %12 = vsyncpa [#allocation9], 0  ;;  %s577_s12 = smov [#allocation2]   ;;  %s578_s14 = smov [#allocation5]  }
   0x4   :  { %s19_s13 = sshll.u32 %s577_s12, 4  ;;  %s29_s15 = sshll.u32 %s578_s14, 4  ;;  %s20_s13 = int_to_ptr.vmem [resolvable:$true] %s19_s13  ;;  %s30_s15 = int_to_ptr.vmem [resolvable:$true] %s29_s15 }
   0x5   :  { %s481_s18 = scalar_lea.hbm %s798_s0, 1024 }
   0x6   :  { %p482_p0 = scmp.ne.s32.totalorder %s798_s0, %s481_s18  ;;  %p485_p1 = scmp.lt.u32.totalorder %s481_s18, %s798_s0 }
   0x8   :  { %p487_p2 = pnand %p485_p1, %p482_p0 }
   0xa   :  { %490 = shalt.err (!%p487_p2)
}
   0xb   :  { %s491_s23 = scalar_lea.vmem %s20_s13, 1024  ;;  %p496_p4 = scmp.lt.s32.totalorder %s20_s13, %s20_s13 }
   0xc   :  { %p492_p3 = scmp.ne.s32.totalorder %s20_s13, %s491_s23  ;;  %p497_p5 = scmp.lt.s32.totalorder %s491_s23, %s491_s23 }
   0xe   :  { %p498_p6 = por %p497_p5, %p496_p4 }
  0x10   :  { %p499_p7 = pnand %p498_p6, %p492_p3 }
  0x12   :  { %502 = shalt.err (!%p499_p7)
}
  0x13   :  { %22 = dma.hbm_to_vmem [thread:$0]  %s798_s0, 1024, %s20_s13, [#allocation3]  }
  0x14   :  { %s503_s28 = scalar_lea.hbm %s799_s1, 1024 }
  0x15   :  { %p504_p8 = scmp.ne.s32.totalorder %s799_s1, %s503_s28  ;;  %p507_p9 = scmp.lt.u32.totalorder %s503_s28, %s799_s1 }
  0x17   :  { %p509_p10 = pnand %p507_p9, %p504_p8 }
  0x19   :  { %512 = shalt.err (!%p509_p10)
}
  0x1a   :  { %s513_s6 = scalar_lea.vmem %s30_s15, 1024  ;;  %p518_p12 = scmp.lt.s32.totalorder %s30_s15, %s30_s15 }
  0x1b   :  { %p514_p11 = scmp.ne.s32.totalorder %s30_s15, %s513_s6  ;;  %p519_p13 = scmp.lt.s32.totalorder %s513_s6, %s513_s6 }
  0x1d   :  { %p520_p0 = por %p519_p13, %p518_p12 }
  0x1f   :  { %p521_p1 = pnand %p520_p0, %p514_p11 }
  0x21   :  { %524 = shalt.err (!%p521_p1)
}
  0x22   :  { %32 = dma.hbm_to_vmem [thread:$0]  %s799_s1, 1024, %s30_s15, [#allocation6]  }
  0x23   :  { %569 = dma.done.wait [#allocation3], 1024  }
  0x24   :  { %570 = vsyncadd [#allocation3], 4294966272 }
  0x25   :  { %571 = dma.done.wait [#allocation6], 1024  }
  0x26   :  { %572 = vsyncadd [#allocation6], 4294966272  ;;  %v39_v0 = vld [vmem:[#allocation2] sm:$0xff]  ;;  %v40_v1 = vld [vmem:[#allocation2 + $0x8] sm:$0xff]  ;;  %v270_v3 = vlaneseq  ;;  %v579_v8 = vmov 1966171168  }
  0x27   :  { %v41_v2 = vld [vmem:[#allocation2 + $0x10] sm:$0xff]  ;;  %v42_v4 = vld [vmem:[#allocation2 + $0x18] sm:$0xff]  ;;  %v43_v5 = vld [vmem:[#allocation2 + $0x20] sm:$0xff]  ;;  %v63_v7 = vmax.f32 %v39_v0, 1e-08  ;;  %v268_v9 = vunpack.c.l.s4 %v579_v8  ;;  %s581_s1 = smov [#allocation7]  }
  0x28   :  { %v44_v6 = vld [vmem:[#allocation2 + $0x28] sm:$0xff]  ;;  %v45_v10 = vld [vmem:[#allocation2 + $0x30] sm:$0xff]  ;;  %v46_v11 = vld [vmem:[#allocation2 + $0x38] sm:$0xff]  ;;  %v64_v12 = vmax.f32 %v40_v1, 1e-08  ;;  %v271_v21 = vshrl.u32 %v270_v3, 7 }
  0x29   :  { %v65_v13 = vmax.f32 %v41_v2, 1e-08  ;;  %v627_v14 = vld [vmem:[#allocation5] sm:$0xff]  ;;  %v629_v15 = vld [vmem:[#allocation5 + $0x8] sm:$0xff]  ;;  %v631_v16 = vld [vmem:[#allocation5 + $0x10] sm:$0xff]  ;;  %v71_v25 = vmin.f32 %v63_v7, 1.0  ;;  %v269_v26 = vunpack.c.0.s8 %v268_v9 }
  0x2a   :  { %v633_v17 = vld [vmem:[#allocation5 + $0x18] sm:$0xff]  ;;  %v635_v18 = vld [vmem:[#allocation5 + $0x20] sm:$0xff]  ;;  %v637_v19 = vld [vmem:[#allocation5 + $0x28] sm:$0xff]  ;;  %v66_v20 = vmax.f32 %v42_v4, 1e-08  ;;  %v72_v29 = vmin.f32 %v64_v12, 1.0 }
  0x2b   :  { %v639_v22 = vld [vmem:[#allocation5 + $0x30] sm:$0xff]  ;;  %v67_v23 = vmax.f32 %v43_v5, 1e-08  ;;  %v68_v24 = vmax.f32 %v44_v6, 1e-08  ;;  %v73_v30 = vmin.f32 %v65_v13, 1.0  ;;  %v649_v43 = vsub.s32 %v269_v26, %v271_v21 }
  0x2c   :  { %v69_v27 = vmax.f32 %v45_v10, 1e-08  ;;  %v70_v28 = vmax.f32 %v46_v11, 1e-08  ;;  %v641_v31 = vld [vmem:[#allocation5 + $0x38] sm:$0xff]  ;;  %v74_v32 = vmin.f32 %v66_v20, 1.0 }
  0x2d   :  { %v75_v33 = vmin.f32 %v67_v23, 1.0  ;;  %v76_v34 = vmin.f32 %v68_v24, 1.0  ;;  %v79_v35 = vmax.f32 %v627_v14, 1e-08  ;;  %v80_v38 = vmax.f32 %v629_v15, 1e-08 }
  0x2e   :  { %v77_v36 = vmin.f32 %v69_v27, 1.0  ;;  %v78_v37 = vmin.f32 %v70_v28, 1.0  ;;  %v81_v39 = vmax.f32 %v631_v16, 1e-08  ;;  %v82_v40 = vmax.f32 %v633_v17, 1e-08 }
  0x2f   :  { %v83_v41 = vmax.f32 %v635_v18, 1e-08  ;;  %v84_v42 = vmax.f32 %v637_v19, 1e-08  ;;  %v85_v44 = vmax.f32 %v639_v22, 1e-08 }
  0x30   :  { %v86_v45 = vmax.f32 %v641_v31, 1e-08  ;;  %v87_v46 = vmin.f32 %v79_v35, 1.0  ;;  %v88_v47 = vmin.f32 %v80_v38, 1.0  ;;  %v89_v48 = vmin.f32 %v81_v39, 1.0  ;;  %s427_s8 = sshll.u32 %s581_s1, 4  ;;  %s428_s8 = int_to_ptr.vmem [resolvable:$true] %s427_s8 }
  0x31   :  { %v90_v49 = vmin.f32 %v82_v40, 1.0  ;;  %v91_v50 = vmin.f32 %v83_v41, 1.0  ;;  %v92_v51 = vmin.f32 %v84_v42, 1.0  ;;  %v93_v52 = vmin.f32 %v85_v44, 1.0  ;;  %s582_s9 = smov [#allocation8]   ;;  %s525_s11 = scalar_lea.vmem %s428_s8, 128 }
  0x32   :  { %v94_v53 = vmin.f32 %v86_v45, 1.0  ;;  %v95_v54 = vsub.f32 1.0, %v87_v46  ;;  %v96_v55 = vsub.f32 1.0, %v88_v47  ;;  %v97_v56 = vsub.f32 1.0, %v89_v48  ;;  %s437_s10 = sshll.u32 %s582_s9, 4  ;;  %p526_p2 = scmp.ne.s32.totalorder %s428_s8, %s525_s11  ;;  %s438_s10 = int_to_ptr.vmem [resolvable:$true] %s437_s10 }
  0x33   :  { %v98_v57 = vsub.f32 1.0, %v90_v49  ;;  %v99_v58 = vsub.f32 1.0, %v91_v50  ;;  %v100_v59 = vsub.f32 1.0, %v92_v51  ;;  %v101_v60 = vsub.f32 1.0, %v93_v52  ;;  %p530_p3 = scmp.lt.s32.totalorder %s428_s8, %s428_s8  ;;  %p531_p4 = scmp.lt.s32.totalorder %s525_s11, %s525_s11 }
  0x34   :  { %v102_v61 = vsub.f32 1.0, %v94_v53  ;;  %v103_v62 = vsub.f32 1.0, %v71_v25  ;;  %v104_v63 = vsub.f32 1.0, %v72_v29  ;;  %v105_v0 = vsub.f32 1.0, %v73_v30 }
  0x35   :  { %v106_v1 = vsub.f32 1.0, %v74_v32  ;;  %v107_v2 = vsub.f32 1.0, %v75_v33  ;;  %v108_v3 = vsub.f32 1.0, %v76_v34  ;;  %v109_v4 = vsub.f32 1.0, %v77_v36  ;;  %p532_p5 = por %p531_p4, %p530_p3 }
  0x36   :  { %v110_v5 = vsub.f32 1.0, %v78_v37  ;;  %v111_v6 = vmul.f32 %v103_v62, %v95_v54  ;;  %v112_v7 = vmul.f32 %v104_v63, %v96_v55  ;;  %vm55_vm0 = vcmp.ne.f32.partialorder %v627_v14, 255.0 }
  0x37   :  { %v113_v8 = vmul.f32 %v105_v0, %v97_v56  ;;  %v114_v9 = vmul.f32 %v106_v1, %v98_v57  ;;  %v115_v10 = vmul.f32 %v107_v2, %v99_v58  ;;  %v116_v11 = vmul.f32 %v108_v3, %v100_v59  ;;  %p533_p6 = pnand %p532_p5, %p526_p2 }
  0x38   :  { %vm56_vm1 = vcmp.ne.f32.partialorder %v629_v15, 255.0  ;;  %vm57_vm2 = vcmp.ne.f32.partialorder %v631_v16, 255.0  ;;  %vm58_vm3 = vcmp.ne.f32.partialorder %v633_v17, 255.0  ;;  %v117_v12 = vmul.f32 %v109_v4, %v101_v60 }
  0x39   :  { %v118_v13 = vmul.f32 %v110_v5, %v102_v61  ;;  %v119_v20 = vmul.f32 %v87_v46, %v71_v25  ;;  %v120_v21 = vmul.f32 %v88_v47, %v72_v29  ;;  %vm59_vm4 = vcmp.ne.f32.partialorder %v635_v18, 255.0 }
  0x3a   :  { %vm60_vm5 = vcmp.ne.f32.partialorder %v637_v19, 255.0  ;;  %vm61_vm6 = vcmp.ne.f32.partialorder %v639_v22, 255.0  ;;  %v121_v23 = vmul.f32 %v89_v48, %v73_v30  ;;  %v122_v24 = vmul.f32 %v90_v49, %v74_v32 }
  0x3b   :  { %v123_v26 = vmul.f32 %v91_v50, %v75_v33  ;;  %v124_v27 = vmul.f32 %v92_v51, %v76_v34  ;;  %vm62_vm7 = vcmp.ne.f32.partialorder %v641_v31, 255.0  ;;  %v125_v28 = vmul.f32 %v93_v52, %v77_v36 }
  0x3c   :  { %v126_v35 = vmul.f32 %v94_v53, %v78_v37  ;;  %v127_v38 = vadd.f32 %v119_v20, %v111_v6  ;;  %v128_v39 = vadd.f32 %v120_v21, %v112_v7  ;;  %v129_v40 = vadd.f32 %v121_v23, %v113_v8 }
  0x3d   :  { %v130_v41 = vadd.f32 %v122_v24, %v114_v9  ;;  %v131_v25 = vadd.f32 %v123_v26, %v115_v10  ;;  %v132_v29 = vadd.f32 %v124_v27, %v116_v11  ;;  %v133_v42 = vadd.f32 %v125_v28, %v117_v12 }
  0x3e   :  { %v134_v44 = vadd.f32 %v126_v35, %v118_v13  ;;  %v135_v45 = vsub.f32 1.0, %v127_v38  ;;  %v136_v46 = vsub.f32 1.0, %v128_v39  ;;  %v137_v47 = vsub.f32 1.0, %v129_v40 }
  0x3f   :  { %v138_v54 = vsub.f32 1.0, %v130_v41  ;;  %v139_v30 = vsub.f32 1.0, %v131_v25  ;;  %v140_v32 = vsub.f32 1.0, %v132_v29  ;;  %v141_v33 = vsub.f32 1.0, %v133_v42 }
  0x40   :  { %v142_v34 = vsub.f32 1.0, %v134_v44  ;;  %v661_v48 = vmul.f32 %v135_v45, %v135_v45  ;;  %v663_v36 = vmul.f32 %v136_v46, %v136_v46  ;;  %v665_v37 = vmul.f32 %v137_v47, %v137_v47 }
  0x41   :  { %v667_v49 = vmul.f32 %v138_v54, %v138_v54  ;;  %v669_v50 = vmul.f32 %v139_v30, %v139_v30  ;;  %v671_v51 = vmul.f32 %v140_v32, %v140_v32  ;;  %v673_v52 = vmul.f32 %v141_v33, %v141_v33 }
  0x42   :  { %v675_v53 = vmul.f32 %v142_v34, %v142_v34  ;;  %v151_v55 = vsub.f32 0.0, %v661_v48  ;;  %v152_v56 = vsub.f32 0.0, %v663_v36  ;;  %v153_v57 = vsub.f32 0.0, %v665_v37 }
  0x43   :  { %v154_v58 = vsub.f32 0.0, %v667_v49  ;;  %v155_v59 = vsub.f32 0.0, %v669_v50  ;;  %v156_v60 = vsub.f32 0.0, %v671_v51  ;;  %v157_v61 = vsub.f32 0.0, %v673_v52 }
  0x44   :  { %v158_v62 = vsub.f32 0.0, %v675_v53  ;;  %465 = vlog2.f32 %v127_v38  ;;  %v580_v63 = vmov 0.0  }
  0x45   :  { %v451_v0 = vsel %vm55_vm0, 1.0, %v580_v63  ;;  %467 = vlog2.f32 %v128_v39  ;;  %v452_v1 = vsel %vm56_vm1, 1.0, %v580_v63  ;;  %v453_v2 = vsel %vm57_vm2, 1.0, %v580_v63 }
  0x46   :  { %v454_v3 = vsel %vm58_vm3, 1.0, %v580_v63  ;;  %469 = vlog2.f32 %v129_v40  ;;  %v455_v4 = vsel %vm59_vm4, 1.0, %v580_v63  ;;  %v456_v5 = vsel %vm60_vm5, 1.0, %v580_v63 }
  0x47   :  { %v457_v6 = vsel %vm61_vm6, 1.0, %v580_v63  ;;  %471 = vlog2.f32 %v130_v41  ;;  %v701_v7 = vsel %vm62_vm7, 1.0, %v580_v63  ;;  %v314_v8 = vrot.slane %v451_v0, 4 }
  0x48   :  { %v320_v9 = vrot.slane %v452_v1, 4  ;;  %473 = vlog2.f32 %v131_v25  ;;  %v326_v10 = vrot.slane %v453_v2, 4  ;;  %v332_v11 = vrot.slane %v454_v3, 4 }
  0x49   :  { %v338_v12 = vrot.slane %v455_v4, 4  ;;  %475 = vlog2.f32 %v132_v29  ;;  %v315_v13 = vadd.f32 %v451_v0, %v314_v8  ;;  %v344_v21 = vrot.slane %v456_v5, 4 }
  0x4a   :  { %v321_v20 = vadd.f32 %v452_v1, %v320_v9  ;;  %477 = vlog2.f32 %v133_v42  ;;  %v327_v23 = vadd.f32 %v453_v2, %v326_v10  ;;  %v333_v24 = vadd.f32 %v454_v3, %v332_v11 }
  0x4b   :  { %v339_v26 = vadd.f32 %v455_v4, %v338_v12  ;;  %479 = vlog2.f32 %v134_v44  ;;  %v316_v27 = vrot.slane %v315_v13, 2  ;;  %v345_v35 = vadd.f32 %v456_v5, %v344_v21 }
  0x4c   :  { %v322_v28 = vrot.slane %v321_v20, 2  ;;  %v328_v38 = vrot.slane %v327_v23, 2  ;;  %v334_v39 = vrot.slane %v333_v24, 2  ;;  %v350_v41 = vrot.slane %v457_v6, 4 }
  0x4d   :  { %v340_v40 = vrot.slane %v339_v26, 2  ;;  %v317_v25 = vadd.f32 %v316_v27, %v315_v13  ;;  %v346_v46 = vrot.slane %v345_v35, 2  ;;  %v356_v29 = vrot.slane %v701_v7, 4 }
  0x4e   :  { %v323_v45 = vadd.f32 %v322_v28, %v321_v20  ;;  %v466_v47 = vpop.eup %465  ;;  %v329_v54 = vadd.f32 %v328_v38, %v327_v23  ;;  %v335_v30 = vadd.f32 %v334_v39, %v333_v24  ;;  %v704_v32 = vadd.f32 %v457_v6, %v350_v41 }
  0x4f   :  { %v341_v42 = vadd.f32 %v340_v40, %v339_v26  ;;  %v468_v33 = vpop.eup %467  ;;  %v160_v44 = vmul.f32 0.6931472, %v466_v47  ;;  %v318_v34 = vrot.slane %v317_v25, 1  ;;  %v706_v0 = vadd.f32 %v346_v46, %v345_v35 }
  0x50   :  { %v324_v63 = vrot.slane %v323_v45, 1  ;;  %v470_v1 = vpop.eup %469  ;;  %v162_v2 = vmul.f32 0.6931472, %v468_v33  ;;  %v330_v3 = vrot.slane %v329_v54, 1  ;;  %v336_v4 = vrot.slane %v335_v30, 1 }
  0x51   :  { %v342_v5 = vrot.slane %v341_v42, 1  ;;  %v472_v8 = vpop.eup %471  ;;  %v164_v9 = vmul.f32 0.6931472, %v470_v1  ;;  %v175_v10 = vmul.f32 %v160_v44, %v151_v55  ;;  %v710_v11 = vadd.f32 %v318_v34, %v317_v25 }
  0x52   :  { %v712_v6 = vadd.f32 %v324_v63, %v323_v45  ;;  %v474_v12 = vpop.eup %473  ;;  %v166_v13 = vmul.f32 0.6931472, %v472_v8  ;;  %v176_v20 = vmul.f32 %v162_v2, %v152_v56  ;;  %v716_v21 = vadd.f32 %v330_v3, %v329_v54 }
  0x53   :  { %v718_v23 = vadd.f32 %v336_v4, %v335_v30  ;;  %v476_v24 = vpop.eup %475  ;;  %v168_v26 = vmul.f32 0.6931472, %v474_v12  ;;  %v177_v27 = vmul.f32 %v164_v9, %v153_v57  ;;  %v199_v48 = vsel %vm55_vm0, %v175_v10, 0.0 }
  0x54   :  { %v724_v55 = vadd.f32 %v342_v5, %v341_v42  ;;  %v478_v28 = vpop.eup %477  ;;  %v170_v35 = vmul.f32 0.6931472, %v476_v24  ;;  %v178_v36 = vmul.f32 %v166_v13, %v154_v58  ;;  %v200_v56 = vsel %vm56_vm1, %v176_v20, 0.0 }
  0x55   :  { %v207_v38 = vrot.slane %v199_v48, 4  ;;  %v480_v39 = vpop.eup %479  ;;  %v172_v40 = vmul.f32 0.6931472, %v478_v28  ;;  %v179_v37 = vmul.f32 %v168_v26, %v155_v59  ;;  %v201_v14 = vsel %vm57_vm2, %v177_v27, 0.0 }
  0x56   :  { %v213_v57 = vrot.slane %v200_v56, 4  ;;  %v174_v41 = vmul.f32 0.6931472, %v480_v39  ;;  %v180_v25 = vmul.f32 %v170_v35, %v156_v60  ;;  %v202_v49 = vsel %vm58_vm3, %v178_v36, 0.0 }
  0x57   :  { %v208_v58 = vadd.f32 %v207_v38, %v199_v48  ;;  %v181_v15 = vmul.f32 %v172_v40, %v157_v61  ;;  %v203_v45 = vsel %vm59_vm4, %v179_v37, 0.0  ;;  %v219_v59 = vrot.slane %v201_v14, 4 }
  0x58   :  { %v214_v50 = vadd.f32 %v213_v57, %v200_v56  ;;  %v182_v16 = vmul.f32 %v174_v41, %v158_v62  ;;  %v204_v46 = vsel %vm60_vm5, %v180_v25, 0.0  ;;  %v225_v60 = vrot.slane %v202_v49, 4 }
  0x59   :  { %v209_v51 = vrot.slane %v208_v58, 2  ;;  %v205_v17 = vsel %vm61_vm6, %v181_v15, 0.0  ;;  %v220_v54 = vadd.f32 %v219_v59, %v201_v14  ;;  %v231_v52 = vrot.slane %v203_v45, 4 }
  0x5a   :  { %v215_v47 = vrot.slane %v214_v50, 2  ;;  %v206_v18 = vsel %vm62_vm7, %v182_v16, 0.0  ;;  %v226_v30 = vadd.f32 %v225_v60, %v202_v49  ;;  %v237_v42 = vrot.slane %v204_v46, 4 }
  0x5b   :  { %v210_v61 = vadd.f32 %v209_v51, %v208_v58  ;;  %v221_v53 = vrot.slane %v220_v54, 2  ;;  %v232_v62 = vadd.f32 %v231_v52, %v203_v45  ;;  %v243_v44 = vrot.slane %v205_v17, 4 }
  0x5c   :  { %v216_v33 = vadd.f32 %v215_v47, %v214_v50  ;;  %v227_v34 = vrot.slane %v226_v30, 2  ;;  %v238_v63 = vadd.f32 %v237_v42, %v204_v46  ;;  %v249_v1 = vrot.slane %v206_v18, 4 }
  0x5d   :  { %v211_v19 = vrot.slane %v210_v61, 1  ;;  %v222_v22 = vadd.f32 %v221_v53, %v220_v54  ;;  %v233_v3 = vrot.slane %v232_v62, 2  ;;  %v244_v4 = vadd.f32 %v243_v44, %v205_v17 }
  0x5e   :  { %v217_v2 = vrot.slane %v216_v33, 1  ;;  %v228_v8 = vadd.f32 %v227_v34, %v226_v30  ;;  %v239_v9 = vrot.slane %v238_v63, 2  ;;  %v250_v31 = vadd.f32 %v249_v1, %v206_v18 }
  0x5f   :  { %v212_v5 = vadd.f32 %v211_v19, %v210_v61  ;;  %v223_v12 = vrot.slane %v222_v22, 1  ;;  %v234_v13 = vadd.f32 %v233_v3, %v232_v62  ;;  %v245_v20 = vrot.slane %v244_v4, 2 }
  0x60   :  { %v218_v10 = vadd.f32 %v217_v2, %v216_v33  ;;  %v229_v24 = vrot.slane %v228_v8, 1  ;;  %v240_v26 = vadd.f32 %v239_v9, %v238_v63  ;;  %v251_v27 = vrot.slane %v250_v31, 2 }
  0x61   :  { %v348_v48 = vrot.slane %v706_v0, 1  ;;  %v224_v28 = vadd.f32 %v223_v12, %v222_v22  ;;  %v235_v35 = vrot.slane %v234_v13, 1  ;;  %v246_v36 = vadd.f32 %v245_v20, %v244_v4 }
  0x62   :  { %v263_v56 = vcombine.low %v212_v5, %v218_v10  ;;  %v230_v38 = vadd.f32 %v229_v24, %v228_v8  ;;  %v241_v39 = vrot.slane %v240_v26, 1  ;;  %v252_v40 = vadd.f32 %v251_v27, %v250_v31 }
  0x63   :  { %v349_v37 = vadd.f32 %v348_v48, %v706_v0  ;;  %v236_v14 = vadd.f32 %v235_v35, %v234_v13  ;;  %v247_v57 = vrot.slane %v246_v36, 1  ;;  %v352_v25 = vrot.slane %v704_v32, 2 }
  0x64   :  { %v273_v41 = vrot.slane %v263_v56, %v649_v43  ;;  %v242_v49 = vadd.f32 %v241_v39, %v240_v26  ;;  %v253_v58 = vrot.slane %v252_v40, 1  ;;  %v264_v15 = vcombine.low %v224_v28, %v230_v38 }
  0x65   :  { %v357_v45 = vadd.f32 %v701_v7, %v356_v29  ;;  %v248_v50 = vadd.f32 %v247_v57, %v246_v36  ;;  %v353_v59 = vadd.f32 %v352_v25, %v704_v32  ;;  %v370_v16 = vcombine.low %v710_v11, %v712_v6 }
  0x66   :  { %v371_v0 = vcombine.low %v716_v21, %v718_v23  ;;  %v254_v46 = vadd.f32 %v253_v58, %v252_v40  ;;  %v265_v51 = vcombine.low %v236_v14, %v242_v49  ;;  %v280_v60 = vrot.slane %v264_v15, %v649_v43 }
  0x67   :  { %v358_v17 = vrot.slane %v357_v45, 2  ;;  %v354_v47 = vrot.slane %v353_v59, 1  ;;  %v372_v29 = vcombine.low %v724_v55, %v349_v37  ;;  %v380_v32 = vrot.slane %v370_v16, %v649_v43 }
  0x68   :  { %v266_v54 = vcombine.low %v248_v50, %v254_v46  ;;  %v287_v52 = vrot.slane %v265_v51, %v649_v43  ;;  %v295_v18 = vcombine.low %v273_v41, %v280_v60  ;;  %v387_v21 = vrot.slane %v371_v0, %v649_v43 }
  0x69   :  { %v359_v7 = vadd.f32 %v358_v17, %v357_v45  ;;  %v355_v6 = vadd.f32 %v354_v47, %v353_v59  ;;  %v394_v62 = vrot.slane %v372_v29, %v649_v43 }
  0x6a   :  { %v294_v11 = vrot.slane %v266_v54, %v649_v43  ;;  %v303_v30 = vrot.slane %v295_v18, %v649_v43  ;;  %v402_v55 = vcombine.low %v380_v32, %v387_v21 }
  0x6b   :  { %v360_v61 = vrot.slane %v359_v7, 1 }
  0x6c   :  { %v296_v23 = vcombine.low %v287_v52, %v294_v11  ;;  %v410_v63 = vrot.slane %v402_v55, %v649_v43 }
  0x6d   :  { %v361_v42 = vadd.f32 %v360_v61, %v359_v7 }
  0x6e   :  { %v310_v33 = vrot.slane %v296_v23, %v649_v43 }
  0x6f   :  { %v373_v53 = vcombine.low %v355_v6, %v361_v42 }
  0x70   :  { %v311_v44 = vcombine.low %v303_v30, %v310_v33 }
  0x71   :  { %v401_v19 = vrot.slane %v373_v53, %v649_v43 }
  0x72   :  { %313 = vst [vmem:[#allocation7] sm:$0xff] %v311_v44 }
  0x73   :  { %v403_v34 = vcombine.low %v394_v62, %v401_v19 }
  0x74   :  { %536 = shalt.err (!%p533_p6)
}
  0x75   :  { %s537_s14 = scalar_lea.hbm %s800_s2, 128 }
  0x76   :  { %p538_p7 = scmp.ne.s32.totalorder %s800_s2, %s537_s14  ;;  %p541_p8 = scmp.lt.u32.totalorder %s537_s14, %s800_s2 }
  0x78   :  { %p543_p9 = pnand %p541_p8, %p538_p7 }
  0x7a   :  { %546 = shalt.err (!%p543_p9)
}
  0x7b   :  { %430 = dma.vmem_to_hbm [thread:$0]  %s428_s8, 128, %s800_s2, [#allocation4]   ;;  %v417_v1 = vrot.slane %v403_v34, %v649_v43 }
  0x7c   :  { %s547_s21 = scalar_lea.vmem %s438_s10, 128  ;;  %p552_p11 = scmp.lt.s32.totalorder %s438_s10, %s438_s10 }
  0x7d   :  { %v418_v2 = vcombine.low %v410_v63, %v417_v1  ;;  %p548_p10 = scmp.ne.s32.totalorder %s438_s10, %s547_s21  ;;  %p553_p12 = scmp.lt.s32.totalorder %s547_s21, %s547_s21 }
  0x7f   :  { %420 = vst [vmem:[#allocation8] sm:$0xff] %v418_v2  ;;  %p554_p13 = por %p553_p12, %p552_p11 }
  0x81   :  { %p555_p0 = pnand %p554_p13, %p548_p10 }
  0x83   :  { %558 = shalt.err (!%p555_p0)
}
  0x84   :  { %s559_s24 = scalar_lea.hbm %s801_s3, 128 }
  0x85   :  { %p560_p1 = scmp.ne.s32.totalorder %s801_s3, %s559_s24  ;;  %p563_p2 = scmp.lt.u32.totalorder %s559_s24, %s801_s3 }
  0x87   :  { %p565_p3 = pnand %p563_p2, %p560_p1 }
  0x89   :  { %568 = shalt.err (!%p565_p3)
}
  0x8a   :  { %440 = dma.vmem_to_hbm [thread:$0]  %s438_s10, 128, %s801_s3, [#allocation9]  }
  0x8b   :  { %573 = dma.done.wait [#allocation4], 128  }
  0x8c   :  { %574 = vsyncadd [#allocation4], 4294967168 }
  0x8d   :  { %575 = dma.done.wait [#allocation9], 128  }
  0x8e   :  { %576 = vsyncadd [#allocation9], 4294967168 }
  0x8f   :  { %447 = vsyncpa [#allocation3], 1 }
  0x90   :  { %448 = vsyncpa [#allocation6], 1 }
  0x91   :  { %449 = vsyncpa [#allocation4], 1 }
  0x92   :  { %450 = vsyncpa [#allocation9], 1 }

</bundles_post_ra>
